<compile_context>
chip_gen: v6e
topology: v6e:2x2x1
jax: 0.10.0
libtpu: 0.0.40
codegen_flags: <defaults>
</compile_context>

<pallas_src>
import math

import numpy as np
import jax
import jax.numpy as jnp
from jax.experimental import pallas as pl
from jax.experimental.pallas import tpu as pltpu


# ---------------------------------------------------------------------------
# Pallas kernel: (scale-folded) linear head + clamp of channel 0
# ---------------------------------------------------------------------------
def _note_head_kernel(feat_ref, w_ref, bounds_ref, o_ref):
    # bf16 operands, f32 MXU accumulation.  Weight already carries the
    # 1/note_bd_temperature factor; bias is zero by construction and skipped.
    y = jnp.dot(feat_ref[...], w_ref[...],
                preferred_element_type=jnp.float32)        # (tm, Cp) f32
    lo = bounds_ref[0:1, :]                                 # (1, Cp) f32
    hi = bounds_ref[1:2, :]                                 # (1, Cp) f32
    # lo/hi are -/+inf except channel 0 (= -16 / +16): channel 0 gets the
    # clamp, everything else passes through unchanged.
    o_ref[...] = jnp.minimum(jnp.maximum(y, lo), hi).astype(o_ref.dtype)


def _round_up(x, m):
    return ((x + m - 1) // m) * m


def _choose_tm(BT, H, Cp, *, in_bytes=2, out_bytes=2,
               max_tm=8192, vmem_budget_bytes=12 << 20):
    """Pick the row tile.

    * Big tiles (up to 8192 rows) amortize the ~0.35 us per-grid-step
      pipeline overhead and emit large, efficient DMAs.
    * VMEM-aware cap: double-buffered input + output tiles must fit a budget
      that is safe on every generation's default scoped VMEM (12 MiB leaves
      headroom even on v5e's 16 MiB default; raise for v6e/v7x if desired).
    * Multiple of 16 (bf16 sublane packing) unless it covers the full extent.
    * Once BT >= 1024, guarantee >= 2 grid steps (rounded to an even count)
      so v7x's two TensorCores are both fed by the "parallel" grid axis.
    """
    per_row = 2 * (H * in_bytes + Cp * out_bytes)           # double-buffered
    cap = max(16, (vmem_budget_bytes // per_row) // 16 * 16)
    max_tm = max(16, min(max_tm, cap))
    if BT < 1024:
        # Tiny problem: one full-extent block (always layout-legal); splitting
        # would only add per-step overhead.
        return min(BT, max_tm)
    steps = max(2, pl.cdiv(BT, max_tm))
    if steps % 2:
        steps += 1                                          # even core balance
    return min(max_tm, _round_up(pl.cdiv(BT, steps), 16))


def note_head_pallas(feat, weight_t, bounds, out_dim, *, tm=None,
                     out_dtype=jnp.bfloat16):
    """feat: [B, T, H]; weight_t: [H, Cp] bf16 (scale folded, zero-padded);
    bounds: [2, Cp] f32 (row 0 = lower clamp, row 1 = upper clamp).

    Returns scaled logits [B, T, out_dim] with channel 0 clamped to [-16, 16].
    """
    B, T, H = feat.shape
    Cp = weight_t.shape[1]
    BT = B * T
    # Cast activations to bf16 at the producer so the kernel's input DMA
    # stream (and input VMEM buffers) are half-width.
    feat2d = feat.reshape(BT, H).astype(jnp.bfloat16)
    if tm is None:
        tm = _choose_tm(BT, H, Cp,
                        out_bytes=jnp.dtype(out_dtype).itemsize)

    out2d = pl.pallas_call(
        _note_head_kernel,
        out_shape=jax.ShapeDtypeStruct((BT, Cp), out_dtype),
        grid_spec=pltpu.PrefetchScalarGridSpec(
            num_scalar_prefetch=0,
            grid=(pl.cdiv(BT, tm),),
            in_specs=[
                pl.BlockSpec((tm, H), lambda i: (i, 0)),
                # constant index_maps: weight / bounds stay resident in VMEM
                pl.BlockSpec((H, Cp), lambda i: (0, 0)),
                pl.BlockSpec((2, Cp), lambda i: (0, 0)),
            ],
            out_specs=pl.BlockSpec((tm, Cp), lambda i: (i, 0)),
        ),
        compiler_params=pltpu.CompilerParams(
            dimension_semantics=("parallel",)),
    )(feat2d, weight_t, bounds)

    # Slice the zero-padded channels back off outside the kernel.
    return out2d[:, :out_dim].reshape(B, T, out_dim)


# ---------------------------------------------------------------------------
# regulate_boundary: sequential, data-dependent host-side post-processing
# (numpy port of the PyTorch reference; runs on CPU just like the original).
# ---------------------------------------------------------------------------
# TODO(synk): regulate_boundary has no clean Pallas equivalent (per-element
# sequential state machine over time); kept on host in numpy.
def regulate_boundary_np(bd_logits, threshold, min_gap=18, ref_bd=None,
                         ref_bd_min_gap=8, non_padding=None):
    bd_logits = 1.0 / (1.0 + np.exp(-np.asarray(bd_logits, dtype=np.float64)))
    bd = (bd_logits > threshold).astype(np.int64)
    bd_res = np.zeros_like(bd)
    for i in range(bd.shape[0]):
        bd_i = bd[i]
        last_bd_idx = -1
        start = -1
        for j in range(bd_i.shape[0]):
            if bd_i[j] == 1:
                if 0 <= start < j:
                    continue
                elif start < 0:
                    start = j
            elif 0 <= start < j:
                if j - 1 > start:
                    bd_idx = start + int(np.argmax(bd_logits[i, start:j]))
                else:
                    bd_idx = start
                if bd_idx - last_bd_idx < min_gap and last_bd_idx > 0:
                    bd_idx = round((bd_idx + last_bd_idx) / 2)
                    bd_res[i, last_bd_idx] = 0
                bd_res[i, bd_idx] = 1
                last_bd_idx = bd_idx
                start = -1
    if ref_bd is not None and ref_bd_min_gap > 0:
        ref = np.asarray(ref_bd)
        for i in range(bd_res.shape[0]):
            ref_bd_i = ref[i]
            ref_bd_i_js = []
            L = bd_res.shape[1]
            for j in range(ref_bd_i.shape[0]):
                if ref_bd_i[j] == 1:
                    ref_bd_i_js.append(j)
                    seg_sum = np.sum(
                        bd_res[i, max(0, j - ref_bd_min_gap): j + ref_bd_min_gap])
                    if seg_sum == 0:
                        bd_res[i, j] = 1
                    elif seg_sum == 1 and bd_res[i, j] != 1:
                        bd_res[i, max(0, j - ref_bd_min_gap): j + ref_bd_min_gap] = \
                            ref_bd_i[max(0, j - ref_bd_min_gap): j + ref_bd_min_gap]
                    elif seg_sum > 1:
                        for k in range(1, ref_bd_min_gap + 1):
                            if bd_res[i, max(0, j - k)] == 1 and ref_bd_i[max(0, j - k)] != 1:
                                bd_res[i, max(0, j - k)] = 0
                                break
                            if bd_res[i, min(L - 1, j + k)] == 1 and ref_bd_i[min(L - 1, j + k)] != 1:
                                bd_res[i, min(L - 1, j + k)] = 0
                                break
                        bd_res[i, j] = 1
            assert np.sum(bd_res[i, ref_bd_i_js]) == len(ref_bd_i_js), \
                f'{np.sum(bd_res[i, ref_bd_i_js])} {len(ref_bd_i_js)}'
    bd_res[:, 0] = 0
    if non_padding is not None:
        for i in range(bd_res.shape[0]):
            bd_res[i, int(np.sum(non_padding[i])) - 1:] = 0
    else:
        bd_res[:, -1] = 0
    return bd_res


# ---------------------------------------------------------------------------
# Module wrapper
# ---------------------------------------------------------------------------
class NoteFramePredictorPallas:
    def __init__(self, hparams, key, *, logits_dtype=jnp.bfloat16):
        self.hidden_size = hidden_size = hparams['hidden_size']
        self.dropout = hparams.get('dropout', 0.0)
        self.out_dim = hparams.get('note_num', 100) + 4 + 1
        self.padded_out_dim = _round_up(self.out_dim, 128)
        self.note_bd_temperature = max(1e-07, hparams.get('note_bd_temperature', 1.0))
        # note_temperature is read for parity with the reference but (like the
        # reference) never used: the torch code divides ALL channels by
        # note_bd_temperature.
        self.note_temperature = max(1e-07, hparams.get('note_temperature', 1.0))
        self.note_bd_threshold = hparams.get('note_bd_threshold', 0.5)
        self.note_bd_min_gap = round(
            hparams.get('note_bd_min_gap', 100) * hparams['audio_sample_rate']
            / 1000 / hparams['hop_size'])
        self.note_bd_ref_min_gap = round(
            hparams.get('note_bd_ref_min_gap', 50) * hparams['audio_sample_rate']
            / 1000 / hparams['hop_size'])
        # bf16 logits by default (HBM-write-bound kernel); opt in to f32 for
        # bit-closer parity with the torch reference.  Behavioural note: with
        # bf16, boundary argmax over near-equal logits can shift by a frame.
        self.logits_dtype = logits_dtype

        # kaiming_normal_(mode='fan_in') on weight [out_dim, hidden]; bias = 0
        std = math.sqrt(2.0 / hidden_size)
        w = jax.random.normal(key, (self.out_dim, hidden_size), jnp.float32) * std
        inv_temp = 1.0 / self.note_bd_temperature
        self._w_f32 = w                                   # [C, H] (reference copy)
        # Fold 1/temperature into the (static) weight in f32, zero-pad the
        # channel dim to a lane-dense multiple of 128, then cast to bf16.
        w_scaled_t = (w.T * inv_temp).astype(jnp.float32)          # [H, C]
        w_padded = jnp.zeros((hidden_size, self.padded_out_dim), jnp.float32)
        w_padded = w_padded.at[:, :self.out_dim].set(w_scaled_t)
        self.weight_t = w_padded.astype(jnp.bfloat16)              # [H, Cp]
        # Bias is zero-initialized and never trained in this module, so it is
        # skipped in the kernel (kept here only for the reference check).
        self.bias_raw = jnp.zeros((self.out_dim,), jnp.float32)
        # Per-channel clamp bounds: only channel 0 gets [-16, 16].
        lo = jnp.full((self.padded_out_dim,), -jnp.inf, jnp.float32).at[0].set(-16.0)
        hi = jnp.full((self.padded_out_dim,), jnp.inf, jnp.float32).at[0].set(16.0)
        self.bounds = jnp.stack([lo, hi], axis=0)                  # [2, Cp]

    def forward(self, feat, ret, word_bd, non_padding, train):
        # dropout with p=0.0 (default) is identity; in eval it is identity anyway.
        frame_logits = note_head_pallas(
            feat, self.weight_t, self.bounds, self.out_dim,
            out_dtype=self.logits_dtype)                   # [B, T, C]
        note_bd_logits = frame_logits[:, :, 0]        # already scaled + clamped in kernel
        note_frame_logits = frame_logits[:, :, 1:]    # already scaled in kernel
        ret['note_bd_logits'] = note_bd_logits
        ret['note_frame_logits'] = note_frame_logits
        if not train:
            ret['note_bd_pred'] = jnp.asarray(
                regulate_boundary_np(
                    np.asarray(note_bd_logits.astype(jnp.float32)),
                    self.note_bd_threshold,
                    self.note_bd_min_gap,
                    None if word_bd is None else np.asarray(word_bd),
                    self.note_bd_ref_min_gap,
                    None if non_padding is None else np.asarray(non_padding)),
                dtype=jnp.int32)

    # pure-JAX reference for correctness checks
    def reference_logits(self, feat):
        logits = jnp.einsum('bth,ch->btc', feat, self._w_f32) + self.bias_raw
        scaled = logits / self.note_bd_temperature
        bd = jnp.clip(scaled[:, :, :1], -16.0, 16.0)
        return jnp.concatenate([bd, scaled[:, :, 1:]], axis=-1)


# ---------------------------------------------------------------------------
# Demo
# ---------------------------------------------------------------------------
if __name__ == "__main__":
    hparams = {
        'hidden_size': 32,
        'note_num': 100,              # default -> out_dim = 105, padded to 128
        'note_bd_temperature': 0.8,
        'note_temperature': 1.0,
        'note_bd_threshold': 0.5,
        'note_bd_min_gap': 100,
        'note_bd_ref_min_gap': 50,
        'audio_sample_rate': 24000,
        'hop_size': 128,
        'dropout': 0.0,
    }

    key = jax.random.PRNGKey(0)
    k_w, k_feat, k_bd = jax.random.split(key, 3)

    B, T, H = 2, 16, hparams['hidden_size']
    feat = jax.random.normal(k_feat, (B, T, H), jnp.float32)

    # synthetic word boundaries and non-padding mask
    word_bd = (jax.random.uniform(k_bd, (B, T)) > 0.8).astype(jnp.int32)
    word_bd = word_bd.at[:, 0].set(0).at[:, -1].set(0)
    non_padding = jnp.ones((B, T), jnp.int32)

    model = NoteFramePredictorPallas(hparams, k_w)
    ret = {}
    model.forward(feat, ret, word_bd, non_padding, train=False)

    jax.block_until_ready(ret['note_bd_logits'])
    jax.block_until_ready(ret['note_frame_logits'])
    jax.block_until_ready(ret['note_bd_pred'])

    assert ret['note_bd_logits'].shape == (B, T)
    assert ret['note_frame_logits'].shape == (B, T, model.out_dim - 1)
    assert ret['note_bd_pred'].shape == (B, T)
    bd_f32 = ret['note_bd_logits'].astype(jnp.float32)
    assert bool(jnp.all(bd_f32 <= 16.0)) and bool(jnp.all(bd_f32 >= -16.0))

    # correctness vs pure-JAX f32 reference (bf16 operand/output tolerance)
    ref = model.reference_logits(feat)
    got = jnp.concatenate(
        [ret['note_bd_logits'][:, :, None], ret['note_frame_logits']],
        axis=-1).astype(jnp.float32)
    np.testing.assert_allclose(np.asarray(got), np.asarray(ref),
                               rtol=5e-2, atol=5e-2)

    print("KERNEL_OK")
</pallas_src>

<mosaic_0001>
module attributes {stable_mosaic.version = 11 : i64} {
  func.func @_note_head_kernel(%arg0: i32, %arg1: memref<32x32xbf16, #tpu.memory_space<vmem>>, %arg2: memref<32x128xbf16, #tpu.memory_space<vmem>>, %arg3: memref<2x128xf32, #tpu.memory_space<vmem>>, %arg4: memref<32x128xbf16, #tpu.memory_space<vmem>>) attributes {dimension_semantics = [#tpu.dimension_semantics<parallel>], iteration_bounds = array<i64: 1>, scalar_prefetch = 0 : i64, scratch_operands = 0 : i64, tpu.core_type = #tpu.core_type<tc>, window_params = [{transform_indices = @transform_0, window_bounds = array<i64: 32, 32>}, {pipeline_mode = #tpu.pipeline_mode<synchronous>, transform_indices = @transform_1, window_bounds = array<i64: 32, 128>}, {pipeline_mode = #tpu.pipeline_mode<synchronous>, transform_indices = @transform_2, window_bounds = array<i64: 2, 128>}, {transform_indices = @transform_3, window_bounds = array<i64: 32, 128>}]} {
    %c0 = arith.constant 0 : index
    %c0_0 = arith.constant 0 : index
    %0 = vector.load %arg1[%c0, %c0_0] : memref<32x32xbf16, #tpu.memory_space<vmem>>, vector<32x32xbf16>
    %c0_1 = arith.constant 0 : index
    %c0_2 = arith.constant 0 : index
    %1 = vector.load %arg2[%c0_1, %c0_2] : memref<32x128xbf16, #tpu.memory_space<vmem>>, vector<32x128xbf16>
    %cst = arith.constant dense<0.000000e+00> : vector<32x128xf32>
    %2 = tpu.matmul %0, %1, %cst {dimension_numbers = #tpu.dot_dimension_numbers<[1], [0], [0], [1], [0, 0, 1, 1], [], []>} : vector<32x32xbf16>, vector<32x128xbf16>, vector<32x128xf32> -> vector<32x128xf32>
    %c0_3 = arith.constant 0 : index
    %c0_4 = arith.constant 0 : index
    %3 = vector.load %arg3[%c0_3, %c0_4] : memref<2x128xf32, #tpu.memory_space<vmem>>, vector<1x128xf32>
    %c1 = arith.constant 1 : index
    %c0_5 = arith.constant 0 : index
    %4 = vector.load %arg3[%c1, %c0_5] : memref<2x128xf32, #tpu.memory_space<vmem>>, vector<1x128xf32>
    %5 = vector.broadcast %3 : vector<1x128xf32> to vector<32x128xf32>
    %6 = arith.maximumf %2, %5 : vector<32x128xf32>
    %7 = vector.broadcast %4 : vector<1x128xf32> to vector<32x128xf32>
    %8 = arith.minimumf %6, %7 : vector<32x128xf32>
    %9 = arith.truncf %8 : vector<32x128xf32> to vector<32x128xbf16>
    %c0_6 = arith.constant 0 : index
    %c0_7 = arith.constant 0 : index
    %10 = vector.load %arg4[%c0_6, %c0_7] : memref<32x128xbf16, #tpu.memory_space<vmem>>, vector<32x128xbf16>
    tpu.vector_store %arg4[%c0_6, %c0_7], %9 {strides = array<i32>} : memref<32x128xbf16, #tpu.memory_space<vmem>>, vector<32x128xbf16>,
    return
  }
  func.func @transform_0(%arg0: i32) -> (i32, i32) {
    %c0_i32 = arith.constant 0 : i32
    %c0_i32_0 = arith.constant 0 : i32
    return %arg0, %c0_i32 : i32, i32
  }
  func.func @transform_1(%arg0: i32) -> (i32, i32) {
    %c0_i32 = arith.constant 0 : i32
    %c0_i32_0 = arith.constant 0 : i32
    %c0_i32_1 = arith.constant 0 : i32
    return %c0_i32, %c0_i32_0 : i32, i32
  }
  func.func @transform_2(%arg0: i32) -> (i32, i32) {
    %c0_i32 = arith.constant 0 : i32
    %c0_i32_0 = arith.constant 0 : i32
    %c0_i32_1 = arith.constant 0 : i32
    return %c0_i32, %c0_i32_0 : i32, i32
  }
  func.func @transform_3(%arg0: i32) -> (i32, i32) {
    %c0_i32 = arith.constant 0 : i32
    %c0_i32_0 = arith.constant 0 : i32
    return %arg0, %c0_i32 : i32, i32
  }
}

</mosaic_0001>

<bundles_post_ra>
// kernel: tpu_custom_call.1
= control target key start
LH: loop header
LB: loop body
LE: loop exit
PB: predicated region body
PF: predicated region fallthrough
CT: control target
= control target key end

     0   :  { %8 = vsyncpa [#allocation3], 0  ;;  %s349_s0 = inlined_call_operand.hbm [shape: bf16[32,32], index: 0, kind: input, shape index: {}]   ;;  %s350_s1 = inlined_call_operand.hbm [shape: bf16[32,128], index: 1, kind: input, shape index: {}]   ;;  %s351_s2 = inlined_call_operand.vmem [shape: f32[2,128], index: 2, kind: input, shape index: {}]   ;;  %s352_s3 = inlined_call_operand.hbm [shape: bf16[32,128], index: 3, kind: output, shape index: {}]  }
   0x1   :  { %9 = vsyncpa [#allocation6], 0 }
   0x2   :  { %10 = vsyncpa [#allocation4], 0  ;;  %s300_s12 = smov [#allocation2]  }
   0x3   :  { %s16_s13 = sshll.u32 %s300_s12, 4  ;;  %s17_s13 = int_to_ptr.vmem [resolvable:$true] %s16_s13 }
   0x4   :  { %s242_s14 = scalar_lea.vmem %s17_s13, 256  ;;  %p247_p1 = scmp.lt.s32.totalorder %s17_s13, %s17_s13 }
   0x5   :  { %p243_p0 = scmp.ne.s32.totalorder %s17_s13, %s242_s14  ;;  %p248_p2 = scmp.lt.s32.totalorder %s242_s14, %s242_s14 }
   0x7   :  { %p249_p3 = por %p248_p2, %p247_p1 }
   0x9   :  { %p250_p4 = pnand %p249_p3, %p243_p0 }
   0xb   :  { %253 = shalt.err (!%p250_p4)
}
   0xc   :  { %s301_s15 = smov 64   ;;  %s302_s16 = smov 4  }
   0xd   :  { %22 = dma.hbm_to_vmem [thread:$0]  %s349_s0, 256, %s17_s13, [#allocation3], %s301_s15, %s301_s15, %s302_s16  }
   0xe   :  { %s303_s19 = smov [#allocation5]  }
   0xf   :  { %s28_s20 = sshll.u32 %s303_s19, 4  ;;  %s29_s20 = int_to_ptr.vmem [resolvable:$true] %s28_s20 }
  0x10   :  { %s262_s21 = scalar_lea.vmem %s29_s20, 256  ;;  %p267_p6 = scmp.lt.s32.totalorder %s29_s20, %s29_s20 }
  0x11   :  { %p263_p5 = scmp.ne.s32.totalorder %s29_s20, %s262_s21  ;;  %p268_p7 = scmp.lt.s32.totalorder %s262_s21, %s262_s21 }
  0x13   :  { %p269_p8 = por %p268_p7, %p267_p6 }
  0x15   :  { %p270_p9 = pnand %p269_p8, %p263_p5 }
  0x17   :  { %273 = shalt.err (!%p270_p9)
}
  0x18   :  { %34 = dma.hbm_to_vmem [thread:$0]  %s350_s1, 256, %s29_s20, [#allocation6], %s301_s15, %s301_s15, %s302_s16  }
  0x19   :  { %294 = dma.done.wait [#allocation3], 256  }
  0x1a   :  { %295 = vsyncadd [#allocation3], 4294967040 }
  0x1b   :  { %296 = dma.done.wait [#allocation6], 256  }
  0x1c   :  { %297 = vsyncadd [#allocation6], 4294967040  ;;  %v230_v0 = vld [vmem:[#allocation5 + $0x8] sm:$0xff]   ;;  %v231_v1 = vld [vmem:[#allocation5] sm:$0xff]   ;;  %vm74_vm0 = vcmask 261120   ;;  %s304_s26 = smov [#allocation7]  }
  0x1d   :  { %217 = vmatprep.subr.bf16.mxu0 %v230_v0  ;;  %v232_v2 = vld [vmem:[#allocation2] sm:$0xff]   ;;  %v233_v3 = vld [vmem:[#allocation2 + $0x8] sm:$0xff]   ;;  %s173_s27 = sshll.u32 %s304_s26, 4  ;;  %s174_s27 = int_to_ptr.vmem [resolvable:$true] %s173_s27 }
  0x1e   :  { %218 = vmatpush3.bf16.msra.mxu0 %v230_v0  ;;  %221 = vmatprep.mubr.msk.bf16.mxu0 %vm74_vm0, %v232_v2  ;;  %v192_v5 = vld [vmem:[%s351_s2] ss:$0 sm:$0xff]  ;;  %v193_v8 = vld [vmem:[%s351_s2 + $0x1] ss:$0 sm:$0xff]  ;;  %s274_s28 = scalar_lea.vmem %s174_s27, 256  ;;  %p279_p11 = scmp.lt.s32.totalorder %s174_s27, %s174_s27 }
  0x1f   :  { %219 = vmatprep.subr.bf16.mxu0 %v231_v1  ;;  %p275_p10 = scmp.ne.s32.totalorder %s174_s27, %s274_s28  ;;  %p280_p12 = scmp.lt.s32.totalorder %s274_s28, %s274_s28 }
  0x21   :  { %p281_p13 = por %p280_p12, %p279_p11 }
  0x22   :  { %220 = vmatpush3.bf16.msra.mxu0 %v231_v1 }
  0x23   :  { %p282_p0 = pnand %p281_p13, %p275_p10 }
  0x25   :  { %222 = vmatmul.mubr.msk.bf16.vlgmr.msra.gmra.mxu0 %vm74_vm0, %v233_v3 }
  0xe5   :  { %v223_v4 = vpop.f32.mrf.mxu0 }
  0xe6   :  { %v138_v7 = vmax.f32 %v223_v4, %v192_v5 }
  0xe7   :  { %v115_v6 = vpop.f32.mrf.mxu0 }
  0xe8   :  { %v136_v10 = vmax.f32 %v115_v6, %v192_v5  ;;  %v146_v13 = vmin.f32 %v138_v7, %v193_v8 }
  0xe9   :  { %v224_v9 = vpop.f32.mrf.mxu0 }
  0xea   :  { %v139_v11 = vmax.f32 %v224_v9, %v192_v5  ;;  %v144_v16 = vmin.f32 %v136_v10, %v193_v8 }
  0xeb   :  { %v118_v12 = vpop.f32.mrf.mxu0 }
  0xec   :  { %v147_v14 = vmin.f32 %v139_v11, %v193_v8  ;;  %v137_v15 = vmax.f32 %v118_v12, %v192_v5 }
  0xee   :  { %v210_v17 = vpack.c.bf16 %v147_v14, %v146_v13  ;;  %v145_v18 = vmin.f32 %v137_v15, %v193_v8 }
  0xf0   :  { %212 = vst [vmem:[#allocation7 + $0x8] sm:$0xff] %v210_v17   ;;  %v205_v19 = vpack.c.bf16 %v145_v18, %v144_v16 }
  0xf2   :  { %206 = vst [vmem:[#allocation7] sm:$0xff] %v205_v19  }
  0xf3   :  { %285 = shalt.err (!%p282_p0)
}
  0xf4   :  { %179 = dma.vmem_to_hbm [thread:$0]  %s174_s27, 256, %s352_s3, [#allocation4], %s301_s15, %s301_s15, %s302_s16  }
  0xf5   :  { %298 = dma.done.wait [#allocation4], 256  }
  0xf6   :  { %299 = vsyncadd [#allocation4], 4294967040 }
  0xf7   :  { %183 = vsyncpa [#allocation3], 1 }
  0xf8   :  { %184 = vsyncpa [#allocation6], 1 }
  0xf9   :  { %185 = vsyncpa [#allocation4], 1 }

</bundles_post_ra>
